<compile_context>
chip_gen: v6e
topology: v6e:2x2x1
jax: 0.10.0
libtpu: 0.0.40
codegen_flags: <defaults>
</compile_context>

<pallas_src>
import functools

import jax
import jax.numpy as jnp
from jax.experimental import pallas as pl
from jax.experimental.pallas import tpu as pltpu


def _round_up(n: int, m: int) -> int:
    return ((n + m - 1) // m) * m


def _choose_tiling(batch: int, target_tile_b: int):
    """Pick (tile_b, num_tiles): tile_b multiple of 8, near target, minimal
    batch over-padding, and an even grid-step count when >1 (v7x: 2 TCs)."""
    tile_b = min(target_tile_b, _round_up(batch, 8))
    num_tiles = -(-batch // tile_b)
    if num_tiles > 1 and num_tiles % 2:
        num_tiles += 1                      # even grid => both TensorCores busy
    tile_b = _round_up(-(-batch // num_tiles), 8)
    return tile_b, num_tiles


def dqn_forward_kernel(x_ref, w1_ref, w2_ref, w3_ref, w4_ref, b_ref, out_ref,
                       *, h_p, hh_p, o_p, out_dim):
    """One batch tile of the DQN MLP forward pass.

    x_ref   : (TILE_B, IN)    input dtype (unpadded lanes), streamed per step
    wK_ref  : padded weights  bf16, VMEM-resident across all grid steps
    b_ref   : (8, Dmax)       f32 packed biases, row k = bias of layer k+1
    out_ref : (TILE_B, O_p)   bf16 lane-dense softmax output
    """
    x = x_ref[...].astype(jnp.bfloat16)

    # Layer 1: Linear + ReLU   (Dropout(0.2) is identity at eval -> skipped)
    h = jnp.dot(x, w1_ref[...], preferred_element_type=jnp.float32)
    h = jnp.maximum(h + b_ref[0:1, 0:h_p], 0.0)

    # Layer 2: Linear + ReLU   (Dropout(0.2) is identity at eval -> skipped)
    h = jnp.dot(h.astype(jnp.bfloat16), w2_ref[...],
                preferred_element_type=jnp.float32)
    h = jnp.maximum(h + b_ref[1:2, 0:h_p], 0.0)

    # Layer 3: Linear + ReLU
    h = jnp.dot(h.astype(jnp.bfloat16), w3_ref[...],
                preferred_element_type=jnp.float32)
    h = jnp.maximum(h + b_ref[2:3, 0:hh_p], 0.0)

    # Decision head: Linear + Softmax(dim=-1)
    logits = jnp.dot(h.astype(jnp.bfloat16), w4_ref[...],
                     preferred_element_type=jnp.float32)
    logits = logits + b_ref[3:4, 0:o_p]

    # Mask padded output lanes (f32-safe sentinel) so they don't affect max/sum.
    lane = jax.lax.broadcasted_iota(jnp.int32, logits.shape, 1)
    logits = jnp.where(lane < out_dim, logits, jnp.finfo(jnp.float32).min)

    m = jnp.max(logits, axis=-1, keepdims=True)
    e = jnp.exp(logits - m)
    denom = jnp.sum(e, axis=-1, keepdims=True)
    # approx recip (EUP slot, off the critical path); error << bf16 output rounding
    out_ref[...] = (e * pl.reciprocal(denom, approx=True)).astype(out_ref.dtype)


def dqn_forward(x, params, *, tile_b=4096, trim_output=True):
    """Grid over the batch; weights stay VMEM-resident; x streamed unpadded."""
    w1, b1, w2, b2, w3, b3, w4, b4 = params
    batch, input_dim = x.shape
    hidden_dim = w1.shape[1]
    half_dim = w3.shape[1]
    output_dim = w4.shape[1]

    # Lane-dense padded feature dims (multiples of 128) for weights / outputs.
    # (On v6e/v7x, padding h_p/hh_p to 256 only pays off if the kernel ever
    #  becomes MXU-bound; at these sizes it is HBM-bound, so keep 128.)
    h_p = _round_up(hidden_dim, 128)
    hh_p = _round_up(half_dim, 128)
    o_p = _round_up(output_dim, 128)
    d_max = max(h_p, hh_p, o_p)

    # Adaptive batch tiling: large tiles, minimal batch over-padding, even grid.
    tile_b, num_tiles = _choose_tiling(batch, tile_b)
    batch_p = num_tiles * tile_b
    grid = (num_tiles,)

    # x keeps its true last dim and dtype (no host-side lane pad / bf16 pass).
    if batch_p != batch:
        x = jnp.pad(x, ((0, batch_p - batch), (0, 0)))

    pad2 = lambda a, r, c: jnp.pad(a, ((0, r - a.shape[0]), (0, c - a.shape[1])))
    # Zero padding is exact through the matmuls and ReLU; padded logit lanes
    # are masked inside the kernel before the softmax.
    w1_p = pad2(w1, input_dim, h_p).astype(jnp.bfloat16)
    w2_p = pad2(w2, h_p, h_p).astype(jnp.bfloat16)
    w3_p = pad2(w3, h_p, hh_p).astype(jnp.bfloat16)
    w4_p = pad2(w4, hh_p, o_p).astype(jnp.bfloat16)

    # Pack the four bias rows into one (8, Dmax) f32 slab (one DMA; an (8, *)
    # shape matches the 8-sublane VMEM padding a (4, *) array would get anyway).
    b_pk = jnp.zeros((8, d_max), jnp.float32)
    b_pk = b_pk.at[0, :hidden_dim].set(b1.reshape(-1))
    b_pk = b_pk.at[1, :hidden_dim].set(b2.reshape(-1))
    b_pk = b_pk.at[2, :half_dim].set(b3.reshape(-1))
    b_pk = b_pk.at[3, :output_dim].set(b4.reshape(-1))

    kernel = functools.partial(dqn_forward_kernel,
                               h_p=h_p, hh_p=hh_p, o_p=o_p, out_dim=output_dim)

    # Weights / biases: same block every grid step -> stay VMEM-resident.
    resident = lambda a: pl.BlockSpec(a.shape, lambda i: (0,) * a.ndim)

    # Real (unpadded) arithmetic for the scheduler hint; bytes reflect the
    # actual streamed traffic (f32 x read, bf16 weights, bf16 output write).
    flops = 2 * batch * (input_dim * hidden_dim + hidden_dim * hidden_dim
                         + hidden_dim * half_dim + half_dim * output_dim)
    transcendentals = batch * output_dim
    bytes_accessed = (batch_p * input_dim * x.dtype.itemsize
                      + (w1_p.size + w2_p.size + w3_p.size + w4_p.size) * 2
                      + b_pk.size * 4
                      + batch_p * o_p * 2)

    out = pl.pallas_call(
        kernel,
        out_shape=jax.ShapeDtypeStruct((batch_p, o_p), jnp.bfloat16),
        grid=grid,
        in_specs=[
            # Streamed x tiles; last dim == full array dim, so unpadded is legal.
            # (pl.Buffered(3) would go here only if tile_b had to stay small.)
            pl.BlockSpec((tile_b, input_dim), lambda i: (i, 0)),
            resident(w1_p), resident(w2_p), resident(w3_p), resident(w4_p),
            resident(b_pk),
        ],
        out_specs=pl.BlockSpec((tile_b, o_p), lambda i: (i, 0)),
        compiler_params=pltpu.CompilerParams(
            dimension_semantics=("parallel",)),   # megacore-shardable batch axis
        cost_estimate=pl.CostEstimate(
            flops=flops,
            transcendentals=transcendentals,
            bytes_accessed=bytes_accessed),
    )(x, w1_p, w2_p, w3_p, w4_p, b_pk)

    if trim_output:
        # NOTE: for a fused consumer, pass trim_output=False and read the
        # padded (batch_p, o_p) buffer directly to avoid this extra XLA pass.
        return out[:batch, :output_dim]
    return out


def xavier_uniform(key, fan_in, fan_out, dtype=jnp.float32):
    """Matches nn.init.xavier_uniform_ (gain=1). Stored as [in, out]."""
    bound = float(jnp.sqrt(6.0 / (fan_in + fan_out)))
    return jax.random.uniform(key, (fan_in, fan_out), dtype,
                              minval=-bound, maxval=bound)


def init_params(key, input_dim, hidden_dim, output_dim):
    k1, k2, k3, k4 = jax.random.split(key, 4)
    half = hidden_dim // 2
    w1 = xavier_uniform(k1, input_dim, hidden_dim)
    b1 = jnp.zeros((1, hidden_dim), jnp.float32)
    w2 = xavier_uniform(k2, hidden_dim, hidden_dim)
    b2 = jnp.zeros((1, hidden_dim), jnp.float32)
    w3 = xavier_uniform(k3, hidden_dim, half)
    b3 = jnp.zeros((1, half), jnp.float32)
    w4 = xavier_uniform(k4, half, output_dim)
    b4 = jnp.zeros((1, output_dim), jnp.float32)
    return (w1, b1, w2, b2, w3, b3, w4, b4)


def dqn_reference(x, params, matmul_dtype=jnp.float32):
    """Pure-JAX reference. matmul_dtype=bf16 mirrors the kernel's MXU path."""
    w1, b1, w2, b2, w3, b3, w4, b4 = params
    md = matmul_dtype

    def dot(a, w):
        return jnp.dot(a.astype(md), w.astype(md),
                       preferred_element_type=jnp.float32)

    h = jnp.maximum(dot(x, w1) + b1, 0.0)
    h = jnp.maximum(dot(h, w2) + b2, 0.0)
    h = jnp.maximum(dot(h, w3) + b3, 0.0)
    logits = dot(h, w4) + b4
    m = jnp.max(logits, axis=-1, keepdims=True)
    e = jnp.exp(logits - m)
    return e / jnp.sum(e, axis=-1, keepdims=True)


if __name__ == "__main__":
    # Small shapes consistent with the module (output_dim=11 default).
    batch, input_dim, hidden_dim, output_dim = 8, 32, 32, 11

    key = jax.random.PRNGKey(0)
    k_x, k_p = jax.random.split(key)
    x = jax.random.normal(k_x, (batch, input_dim), jnp.float32)
    params = init_params(k_p, input_dim, hidden_dim, output_dim)

    out = jax.block_until_ready(dqn_forward(x, params))
    out_f32 = out.astype(jnp.float32)

    ref_bf16 = dqn_reference(x, params, matmul_dtype=jnp.bfloat16)
    ref_f32 = dqn_reference(x, params, matmul_dtype=jnp.float32)

    assert out.shape == (batch, output_dim)
    assert out.dtype == jnp.bfloat16
    assert bool(jnp.all(jnp.isfinite(out_f32)))
    # Check vs a reference using the same bf16-operand / f32-accum path
    # (slack covers the bf16 output store and the approx EUP reciprocal).
    assert jnp.allclose(out_f32, ref_bf16, atol=2e-2, rtol=2e-2), \
        "mismatch vs bf16 reference"
    # Looser sanity check vs the full-f32 reference (bf16 operand rounding).
    assert jnp.allclose(out_f32, ref_f32, atol=4e-2, rtol=4e-2), \
        "mismatch vs f32 reference"
    # Softmax rows sum to ~1 (bf16 output + approx reciprocal tolerance).
    assert jnp.allclose(jnp.sum(out_f32, axis=-1), 1.0, atol=3e-2)

    print("KERNEL_OK")
</pallas_src>

<mosaic_0001>
module attributes {stable_mosaic.version = 11 : i64} {
  func.func @dqn_forward_kernel(%arg0: i32, %arg1: memref<8x32xf32, #tpu.memory_space<vmem>>, %arg2: memref<32x128xbf16, #tpu.memory_space<vmem>>, %arg3: memref<128x128xbf16, #tpu.memory_space<vmem>>, %arg4: memref<128x128xbf16, #tpu.memory_space<vmem>>, %arg5: memref<128x128xbf16, #tpu.memory_space<vmem>>, %arg6: memref<8x128xf32, #tpu.memory_space<vmem>>, %arg7: memref<8x128xbf16, #tpu.memory_space<vmem>>) attributes {dimension_semantics = [#tpu.dimension_semantics<parallel>], iteration_bounds = array<i64: 1>, scalar_prefetch = 0 : i64, scratch_operands = 0 : i64, tpu.core_type = #tpu.core_type<tc>, window_params = [{transform_indices = @transform_0, window_bounds = array<i64: 8, 32>}, {pipeline_mode = #tpu.pipeline_mode<synchronous>, transform_indices = @transform_1, window_bounds = array<i64: 32, 128>}, {pipeline_mode = #tpu.pipeline_mode<synchronous>, transform_indices = @transform_2, window_bounds = array<i64: 128, 128>}, {pipeline_mode = #tpu.pipeline_mode<synchronous>, transform_indices = @transform_3, window_bounds = array<i64: 128, 128>}, {pipeline_mode = #tpu.pipeline_mode<synchronous>, transform_indices = @transform_4, window_bounds = array<i64: 128, 128>}, {pipeline_mode = #tpu.pipeline_mode<synchronous>, transform_indices = @transform_5, window_bounds = array<i64: 8, 128>}, {transform_indices = @transform_6, window_bounds = array<i64: 8, 128>}]} {
    %c0 = arith.constant 0 : index
    %c0_0 = arith.constant 0 : index
    %0 = vector.load %arg1[%c0, %c0_0] : memref<8x32xf32, #tpu.memory_space<vmem>>, vector<8x32xf32>
    %1 = arith.truncf %0 : vector<8x32xf32> to vector<8x32xbf16>
    %c0_1 = arith.constant 0 : index
    %c0_2 = arith.constant 0 : index
    %2 = vector.load %arg2[%c0_1, %c0_2] : memref<32x128xbf16, #tpu.memory_space<vmem>>, vector<32x128xbf16>
    %cst = arith.constant dense<0.000000e+00> : vector<8x128xf32>
    %3 = tpu.matmul %1, %2, %cst {dimension_numbers = #tpu.dot_dimension_numbers<[1], [0], [0], [1], [0, 0, 1, 1], [], []>} : vector<8x32xbf16>, vector<32x128xbf16>, vector<8x128xf32> -> vector<8x128xf32>
    %c0_3 = arith.constant 0 : index
    %c0_4 = arith.constant 0 : index
    %4 = vector.load %arg6[%c0_3, %c0_4] : memref<8x128xf32, #tpu.memory_space<vmem>>, vector<1x128xf32>
    %5 = vector.broadcast %4 : vector<1x128xf32> to vector<8x128xf32>
    %6 = arith.addf %3, %5 : vector<8x128xf32>
    %cst_5 = arith.constant 0.000000e+00 : f32
    %7 = vector.broadcast %cst_5 : f32 to vector<8x128xf32>
    %8 = arith.maximumf %6, %7 : vector<8x128xf32>
    %9 = arith.truncf %8 : vector<8x128xf32> to vector<8x128xbf16>
    %c0_6 = arith.constant 0 : index
    %c0_7 = arith.constant 0 : index
    %10 = vector.load %arg3[%c0_6, %c0_7] : memref<128x128xbf16, #tpu.memory_space<vmem>>, vector<128x128xbf16>
    %cst_8 = arith.constant dense<0.000000e+00> : vector<8x128xf32>
    %11 = tpu.matmul %9, %10, %cst_8 {dimension_numbers = #tpu.dot_dimension_numbers<[1], [0], [0], [1], [0, 0, 1, 1], [], []>} : vector<8x128xbf16>, vector<128x128xbf16>, vector<8x128xf32> -> vector<8x128xf32>
    %c1 = arith.constant 1 : index
    %c0_9 = arith.constant 0 : index
    %12 = vector.load %arg6[%c1, %c0_9] : memref<8x128xf32, #tpu.memory_space<vmem>>, vector<1x128xf32>
    %13 = vector.broadcast %12 : vector<1x128xf32> to vector<8x128xf32>
    %14 = arith.addf %11, %13 : vector<8x128xf32>
    %cst_10 = arith.constant 0.000000e+00 : f32
    %15 = vector.broadcast %cst_10 : f32 to vector<8x128xf32>
    %16 = arith.maximumf %14, %15 : vector<8x128xf32>
    %17 = arith.truncf %16 : vector<8x128xf32> to vector<8x128xbf16>
    %c0_11 = arith.constant 0 : index
    %c0_12 = arith.constant 0 : index
    %18 = vector.load %arg4[%c0_11, %c0_12] : memref<128x128xbf16, #tpu.memory_space<vmem>>, vector<128x128xbf16>
    %cst_13 = arith.constant dense<0.000000e+00> : vector<8x128xf32>
    %19 = tpu.matmul %17, %18, %cst_13 {dimension_numbers = #tpu.dot_dimension_numbers<[1], [0], [0], [1], [0, 0, 1, 1], [], []>} : vector<8x128xbf16>, vector<128x128xbf16>, vector<8x128xf32> -> vector<8x128xf32>
    %c2 = arith.constant 2 : index
    %c0_14 = arith.constant 0 : index
    %20 = vector.load %arg6[%c2, %c0_14] : memref<8x128xf32, #tpu.memory_space<vmem>>, vector<1x128xf32>
    %21 = vector.broadcast %20 : vector<1x128xf32> to vector<8x128xf32>
    %22 = arith.addf %19, %21 : vector<8x128xf32>
    %cst_15 = arith.constant 0.000000e+00 : f32
    %23 = vector.broadcast %cst_15 : f32 to vector<8x128xf32>
    %24 = arith.maximumf %22, %23 : vector<8x128xf32>
    %25 = arith.truncf %24 : vector<8x128xf32> to vector<8x128xbf16>
    %c0_16 = arith.constant 0 : index
    %c0_17 = arith.constant 0 : index
    %26 = vector.load %arg5[%c0_16, %c0_17] : memref<128x128xbf16, #tpu.memory_space<vmem>>, vector<128x128xbf16>
    %cst_18 = arith.constant dense<0.000000e+00> : vector<8x128xf32>
    %27 = tpu.matmul %25, %26, %cst_18 {dimension_numbers = #tpu.dot_dimension_numbers<[1], [0], [0], [1], [0, 0, 1, 1], [], []>} : vector<8x128xbf16>, vector<128x128xbf16>, vector<8x128xf32> -> vector<8x128xf32>
    %c3 = arith.constant 3 : index
    %c0_19 = arith.constant 0 : index
    %28 = vector.load %arg6[%c3, %c0_19] : memref<8x128xf32, #tpu.memory_space<vmem>>, vector<1x128xf32>
    %29 = vector.broadcast %28 : vector<1x128xf32> to vector<8x128xf32>
    %30 = arith.addf %27, %29 : vector<8x128xf32>
    %31 = tpu.iota {dimensions = array<i32: 1>} : vector<8x128xi32>
    %c11_i32 = arith.constant 11 : i32
    %32 = vector.broadcast %c11_i32 : i32 to vector<8x128xi32>
    %33 = arith.cmpi slt, %31, %32 : vector<8x128xi32>
    %cst_20 = arith.constant -3.40282347E+38 : f32
    %34 = vector.broadcast %cst_20 : f32 to vector<8x128xf32>
    %35 = arith.select %33, %30, %34 : vector<8x128xi1>, vector<8x128xf32>
    %cst_21 = arith.constant dense<0xFF800000> : vector<8xf32>
    %36 = vector.multi_reduction <maximumf>, %35, %cst_21 [1] : vector<8x128xf32> to vector<8xf32>
    %37 = vector.shape_cast %36 : vector<8xf32> to vector<8x1xf32>
    %38 = vector.broadcast %37 : vector<8x1xf32> to vector<8x128xf32>
    %39 = arith.subf %35, %38 : vector<8x128xf32>
    %40 = math.exp %39 : vector<8x128xf32>
    %cst_22 = arith.constant dense<0.000000e+00> : vector<8xf32>
    %41 = vector.multi_reduction <add>, %40, %cst_22 [1] : vector<8x128xf32> to vector<8xf32>
    %42 = vector.shape_cast %41 : vector<8xf32> to vector<8x1xf32>
    %43 = tpu.reciprocal %42 {approx = true} : vector<8x1xf32> -> vector<8x1xf32>
    %44 = vector.broadcast %43 : vector<8x1xf32> to vector<8x128xf32>
    %45 = arith.mulf %40, %44 : vector<8x128xf32>
    %46 = arith.truncf %45 : vector<8x128xf32> to vector<8x128xbf16>
    %c0_23 = arith.constant 0 : index
    %c0_24 = arith.constant 0 : index
    %47 = vector.load %arg7[%c0_23, %c0_24] : memref<8x128xbf16, #tpu.memory_space<vmem>>, vector<8x128xbf16>
    tpu.vector_store %arg7[%c0_23, %c0_24], %46 {strides = array<i32>} : memref<8x128xbf16, #tpu.memory_space<vmem>>, vector<8x128xbf16>,
    return
  }
  func.func @transform_0(%arg0: i32) -> (i32, i32) {
    %c0_i32 = arith.constant 0 : i32
    %c0_i32_0 = arith.constant 0 : i32
    return %arg0, %c0_i32 : i32, i32
  }
  func.func @transform_1(%arg0: i32) -> (i32, i32) {
    %c0_i32 = arith.constant 0 : i32
    %c0_i32_0 = arith.constant 0 : i32
    %c0_i32_1 = arith.constant 0 : i32
    return %c0_i32, %c0_i32_0 : i32, i32
  }
  func.func @transform_2(%arg0: i32) -> (i32, i32) {
    %c0_i32 = arith.constant 0 : i32
    %c0_i32_0 = arith.constant 0 : i32
    %c0_i32_1 = arith.constant 0 : i32
    return %c0_i32, %c0_i32_0 : i32, i32
  }
  func.func @transform_3(%arg0: i32) -> (i32, i32) {
    %c0_i32 = arith.constant 0 : i32
    %c0_i32_0 = arith.constant 0 : i32
    %c0_i32_1 = arith.constant 0 : i32
    return %c0_i32, %c0_i32_0 : i32, i32
  }
  func.func @transform_4(%arg0: i32) -> (i32, i32) {
    %c0_i32 = arith.constant 0 : i32
    %c0_i32_0 = arith.constant 0 : i32
    %c0_i32_1 = arith.constant 0 : i32
    return %c0_i32, %c0_i32_0 : i32, i32
  }
  func.func @transform_5(%arg0: i32) -> (i32, i32) {
    %c0_i32 = arith.constant 0 : i32
    %c0_i32_0 = arith.constant 0 : i32
    %c0_i32_1 = arith.constant 0 : i32
    return %c0_i32, %c0_i32_0 : i32, i32
  }
  func.func @transform_6(%arg0: i32) -> (i32, i32) {
    %c0_i32 = arith.constant 0 : i32
    %c0_i32_0 = arith.constant 0 : i32
    return %arg0, %c0_i32 : i32, i32
  }
}

</mosaic_0001>

<bundles_post_ra>
// kernel: tpu_custom_call.1
= control target key start
LH: loop header
LB: loop body
LE: loop exit
PB: predicated region body
PF: predicated region fallthrough
CT: control target
= control target key end

     0   :  { %11 = vsyncpa [#allocation3], 0  ;;  %s941_s0 = inlined_call_operand.hbm [shape: f32[8,32], index: 0, kind: input, shape index: {}]   ;;  %s942_s1 = inlined_call_operand.hbm [shape: bf16[32,128], index: 1, kind: input, shape index: {}]   ;;  %s943_s2 = inlined_call_operand.hbm [shape: bf16[128,128], index: 2, kind: input, shape index: {}]   ;;  %s944_s3 = inlined_call_operand.hbm [shape: bf16[128,128], index: 3, kind: input, shape index: {}]   ;;  %s945_s4 = inlined_call_operand.hbm [shape: bf16[128,128], index: 4, kind: input, shape index: {}]   ;;  %s946_s5 = inlined_call_operand.vmem [shape: f32[8,128], index: 5, kind: input, shape index: {}]   ;;  %s947_s6 = inlined_call_operand.hbm [shape: bf16[8,128], index: 6, kind: output, shape index: {}]  }
   0x1   :  { %12 = vsyncpa [#allocation6], 0 }
   0x2   :  { %13 = vsyncpa [#allocation9], 0 }
   0x3   :  { %14 = vsyncpa [#allocation4], 0  ;;  %s820_s21 = smov [#allocation5]  }
   0x4   :  { %s30_s22 = sshll.u32 %s820_s21, 4  ;;  %s31_s22 = int_to_ptr.vmem [resolvable:$true] %s30_s22 }
   0x5   :  { %s700_s23 = scalar_lea.vmem %s31_s22, 256  ;;  %p705_p1 = scmp.lt.s32.totalorder %s31_s22, %s31_s22 }
   0x6   :  { %p701_p0 = scmp.ne.s32.totalorder %s31_s22, %s700_s23  ;;  %p706_p2 = scmp.lt.s32.totalorder %s700_s23, %s700_s23 }
   0x8   :  { %p707_p3 = por %p706_p2, %p705_p1 }
   0xa   :  { %p708_p4 = pnand %p707_p3, %p701_p0 }
   0xc   :  { %711 = shalt.err (!%p708_p4)
}
   0xd   :  { %s821_s24 = smov 64   ;;  %s822_s25 = smov 4  }
   0xe   :  { %36 = dma.hbm_to_vmem [thread:$0]  %s942_s1, 256, %s31_s22, [#allocation6], %s821_s24, %s821_s24, %s822_s25  }
   0xf   :  { %s823_s28 = smov [#allocation8]   ;;  %s824_s30 = smov [#allocation2]  }
  0x10   :  { %s54_s29 = sshll.u32 %s823_s28, 4  ;;  %s21_s7 = sshll.u32 %s824_s30, 4  ;;  %s55_s29 = int_to_ptr.vmem [resolvable:$true] %s54_s29  ;;  %s22_s7 = int_to_ptr.vmem [resolvable:$true] %s21_s7 }
  0x11   :  { %s720_s8 = scalar_lea.vmem %s55_s29, 1024  ;;  %p725_p6 = scmp.lt.s32.totalorder %s55_s29, %s55_s29 }
  0x12   :  { %p721_p5 = scmp.ne.s32.totalorder %s55_s29, %s720_s8  ;;  %p726_p7 = scmp.lt.s32.totalorder %s720_s8, %s720_s8 }
  0x14   :  { %p727_p8 = por %p726_p7, %p725_p6 }
  0x16   :  { %p728_p9 = pnand %p727_p8, %p721_p5 }
  0x18   :  { %731 = shalt.err (!%p728_p9)
}
  0x19   :  { %60 = dma.hbm_to_vmem [thread:$0]  %s944_s3, 1024, %s55_s29, [#allocation9], %s821_s24, %s821_s24, %s822_s25  }
  0x1a   :  { %s740_s1 = scalar_lea.vmem %s22_s7, 128  ;;  %p745_p11 = scmp.lt.s32.totalorder %s22_s7, %s22_s7 }
  0x1b   :  { %p741_p10 = scmp.ne.s32.totalorder %s22_s7, %s740_s1  ;;  %p746_p12 = scmp.lt.s32.totalorder %s740_s1, %s740_s1 }
  0x1d   :  { %p747_p13 = por %p746_p12, %p745_p11 }
  0x1f   :  { %p748_p0 = pnand %p747_p13, %p741_p10 }
  0x21   :  { %751 = shalt.err (!%p748_p0)
}
  0x22   :  { %24 = dma.hbm_to_vmem [thread:$0]  %s941_s0, 128, %s22_s7, [#allocation3]  }
  0x23   :  { %s825_s13 = smov [#allocation7]   ;;  %s826_s15 = smov [#allocation10]  }
  0x24   :  { %s42_s14 = sshll.u32 %s825_s13, 4  ;;  %s66_s16 = sshll.u32 %s826_s15, 4  ;;  %s43_s14 = int_to_ptr.vmem [resolvable:$true] %s42_s14  ;;  %s67_s16 = int_to_ptr.vmem [resolvable:$true] %s66_s16 }
  0x25   :  { %s760_s17 = scalar_lea.vmem %s43_s14, 1024  ;;  %p765_p2 = scmp.lt.s32.totalorder %s43_s14, %s43_s14 }
  0x26   :  { %p761_p1 = scmp.ne.s32.totalorder %s43_s14, %s760_s17  ;;  %p766_p3 = scmp.lt.s32.totalorder %s760_s17, %s760_s17 }
  0x28   :  { %p767_p4 = por %p766_p3, %p765_p2 }
  0x2a   :  { %p768_p5 = pnand %p767_p4, %p761_p1 }
  0x2c   :  { %771 = shalt.err (!%p768_p5)
}
  0x2d   :  { %48 = dma.hbm_to_vmem [thread:$0]  %s943_s2, 1024, %s43_s14, [#allocation6], %s821_s24, %s821_s24, %s822_s25  }
  0x2e   :  { %s780_s0 = scalar_lea.vmem %s67_s16, 1024  ;;  %p785_p7 = scmp.lt.s32.totalorder %s67_s16, %s67_s16 }
  0x2f   :  { %p781_p6 = scmp.ne.s32.totalorder %s67_s16, %s780_s0  ;;  %p786_p8 = scmp.lt.s32.totalorder %s780_s0, %s780_s0 }
  0x31   :  { %p787_p9 = por %p786_p8, %p785_p7 }
  0x33   :  { %p788_p10 = pnand %p787_p9, %p781_p6 }
  0x35   :  { %791 = shalt.err (!%p788_p10)
}
  0x36   :  { %72 = dma.hbm_to_vmem [thread:$0]  %s945_s4, 1024, %s67_s16, [#allocation9], %s821_s24, %s821_s24, %s822_s25  }
  0x37   :  { %812 = dma.done.wait [#allocation3], 128  }
  0x38   :  { %813 = vsyncadd [#allocation3], 4294967168 }
  0x39   :  { %814 = dma.done.wait [#allocation6], 1280  }
  0x3a   :  { %815 = vsyncadd [#allocation6], 4294966016 }
  0x3b   :  { %816 = dma.done.wait [#allocation9], 2048  }
  0x3c   :  { %817 = vsyncadd [#allocation9], 4294965248  ;;  %v827_v0 = vmov 0.0   ;;  %vm828_vm0 = vmmov 0   ;;  %v662_v1 = vld [vmem:[#allocation5 + $0x8] sm:$0xff]   ;;  %v663_v2 = vld [vmem:[#allocation5] sm:$0xff]   ;;  %v491_v53 = vlaneseq }
  0x3d   :  { %584 = vmatprep.subr.bf16.mxu0 %v827_v0  ;;  %588 = vmatprep.mubr.msk.bf16.mxu0 %vm828_vm0, %v827_v0  ;;  %v91_v3 = vld [vmem:[#allocation2] sm:$0xff]  ;;  %v664_v4 = vld [vmem:[#allocation7 + $0x38] sm:$0xff]   ;;  %v665_v6 = vld [vmem:[#allocation7 + $0x30] sm:$0xff]   ;;  %vm114_vm1 = vcmask 261120   ;;  %s829_s27 = smov [#allocation11]  }
  0x3e   :  { %592 = vmatprep.subr.bf16.mxu1 %v827_v0  ;;  %608 = vmatprep.mubr.msk.bf16.mxu1 %vm828_vm0, %v827_v0  ;;  %v92_v5 = vpack.c.bf16 %v91_v3, %v91_v3  ;;  %v666_v7 = vld [vmem:[#allocation7 + $0x28] sm:$0xff]   ;;  %v667_v8 = vld [vmem:[#allocation7 + $0x20] sm:$0xff]   ;;  %v668_v9 = vld [vmem:[#allocation7 + $0x18] sm:$0xff]   ;;  %v492_v54 = vand.u32 127, %v491_v53  ;;  %s512_s28 = sshll.u32 %s829_s27, 4  ;;  %s513_s28 = int_to_ptr.vmem [resolvable:$true] %s512_s28 }
  0x3f   :  { %585 = vmatpush3.bf16.msra.mxu0 %v662_v1  ;;  %593 = vmatpush3.bf16.msra.mxu1 %v664_v4  ;;  %v669_v10 = vld [vmem:[#allocation7 + $0x10] sm:$0xff]   ;;  %v670_v11 = vld [vmem:[#allocation7 + $0x8] sm:$0xff]   ;;  %v671_v12 = vld [vmem:[#allocation7] sm:$0xff]   ;;  %p797_p12 = scmp.lt.s32.totalorder %s513_s28, %s513_s28 }
  0x40   :  { %586 = vmatprep.subr.bf16.mxu0 %v827_v0  ;;  %594 = vmatprep.subr.bf16.mxu1 %v827_v0  ;;  %v672_v13 = vld [vmem:[#allocation8 + $0x38] sm:$0xff]   ;;  %v673_v14 = vld [vmem:[#allocation8 + $0x30] sm:$0xff]   ;;  %v674_v15 = vld [vmem:[#allocation8 + $0x28] sm:$0xff]   ;;  %vm493_vm2 = vcmp.lt.s32.totalorder %v492_v54, 11 }
  0x41   :  { %v675_v16 = vld [vmem:[#allocation8 + $0x20] sm:$0xff]   ;;  %v676_v17 = vld [vmem:[#allocation8 + $0x18] sm:$0xff]   ;;  %v677_v18 = vld [vmem:[#allocation8 + $0x10] sm:$0xff]  }
  0x42   :  { %v523_v19 = vld [vmem:[%s946_s5] ss:$0 sm:$0xff]  ;;  %v679_v28 = vld [vmem:[#allocation8] sm:$0xff]   ;;  %v680_v29 = vld [vmem:[#allocation10 + $0x38] sm:$0xff]  }
  0x43   :  { %587 = vmatpush3.bf16.msra.mxu0 %v663_v2  ;;  %595 = vmatpush3.bf16.msra.mxu1 %v665_v6  ;;  %v678_v27 = vld [vmem:[#allocation8 + $0x8] sm:$0xff]   ;;  %v681_v30 = vld [vmem:[#allocation10 + $0x30] sm:$0xff]   ;;  %v683_v32 = vld [vmem:[#allocation10 + $0x20] sm:$0xff]  }
  0x44   :  { %612 = vmatprep.subr.bf16.mxu0 %v827_v0  ;;  %596 = vmatprep.subr.bf16.mxu1 %v827_v0  ;;  %v682_v31 = vld [vmem:[#allocation10 + $0x28] sm:$0xff]   ;;  %v684_v33 = vld [vmem:[#allocation10 + $0x18] sm:$0xff]   ;;  %v685_v34 = vld [vmem:[#allocation10 + $0x10] sm:$0xff]  }
  0x45   :  { %v527_v35 = vld [vmem:[%s946_s5 + $0x1] ss:$0 sm:$0xff]  ;;  %v687_v44 = vld [vmem:[#allocation10] sm:$0xff]   ;;  %v536_v45 = vld [vmem:[%s946_s5 + $0x2] ss:$0 sm:$0xff] }
  0x46   :  { %589 = vmatmul.mubr.msk.bf16.vlgmr.msra.gmra.mxu0 %vm114_vm1, %v92_v5  ;;  %v686_v43 = vld [vmem:[#allocation10 + $0x8] sm:$0xff]  }
  0x47   :  { %628 = vmatprep.mubr.msk.bf16.mxu0 %vm828_vm0, %v827_v0  ;;  %597 = vmatpush3.bf16.msra.mxu1 %v666_v7  ;;  %v545_v55 = vld [vmem:[%s946_s5 + $0x3] ss:$0 sm:$0xff]  ;;  %s792_s5 = scalar_lea.vmem %s513_s28, 64 }
  0x48   :  { %598 = vmatprep.subr.bf16.mxu1 %v827_v0  ;;  %613 = vmatpush3.bf16.msra.mxu0 %v672_v13  ;;  %p793_p11 = scmp.ne.s32.totalorder %s513_s28, %s792_s5  ;;  %p798_p13 = scmp.lt.s32.totalorder %s792_s5, %s792_s5 }
  0x49   :  { %614 = vmatprep.subr.bf16.mxu0 %v827_v0 }
  0x4a   :  { %p799_p0 = por %p798_p13, %p797_p12 }
  0x4b   :  { %599 = vmatpush3.bf16.msra.mxu1 %v667_v8 }
  0x4c   :  { %600 = vmatprep.subr.bf16.mxu1 %v827_v0  ;;  %615 = vmatpush3.bf16.msra.mxu0 %v673_v14  ;;  %p800_p1 = pnand %p799_p0, %p793_p11 }
  0x4d   :  { %616 = vmatprep.subr.bf16.mxu0 %v827_v0 }
  0x4f   :  { %601 = vmatpush3.bf16.msra.mxu1 %v668_v9 }
  0x50   :  { %602 = vmatprep.subr.bf16.mxu1 %v827_v0  ;;  %617 = vmatpush3.bf16.msra.mxu0 %v674_v15 }
  0x51   :  { %618 = vmatprep.subr.bf16.mxu0 %v827_v0 }
  0x53   :  { %603 = vmatpush3.bf16.msra.mxu1 %v669_v10 }
  0x54   :  { %604 = vmatprep.subr.bf16.mxu1 %v827_v0  ;;  %619 = vmatpush3.bf16.msra.mxu0 %v675_v16 }
  0x55   :  { %620 = vmatprep.subr.bf16.mxu0 %v827_v0 }
  0x57   :  { %605 = vmatpush3.bf16.msra.mxu1 %v670_v11 }
  0x58   :  { %606 = vmatprep.subr.bf16.mxu1 %v827_v0  ;;  %621 = vmatpush3.bf16.msra.mxu0 %v676_v17 }
  0x59   :  { %622 = vmatprep.subr.bf16.mxu0 %v827_v0 }
  0x5b   :  { %607 = vmatpush3.bf16.msra.mxu1 %v671_v12 }
  0x5c   :  { %632 = vmatprep.subr.bf16.mxu1 %v827_v0  ;;  %623 = vmatpush3.bf16.msra.mxu0 %v677_v18 }
  0x5d   :  { %624 = vmatprep.subr.bf16.mxu0 %v827_v0 }
  0x60   :  { %625 = vmatpush3.bf16.msra.mxu0 %v678_v27 }
  0x61   :  { %626 = vmatprep.subr.bf16.mxu0 %v827_v0 }
  0x64   :  { %627 = vmatpush3.bf16.msra.mxu0 %v679_v28 }
 0x106   :  { %v152_v20 = vpop.f32.mrf.mxu0 }
 0x107   :  { %v153_v21 = vadd.f32 %v523_v19, %v152_v20 }
 0x108   :  { %v590_v22 = vpop.f32.mrf.mxu0 }
 0x109   :  { %v158_v23 = vmax.f32 %v153_v21, 0.0 }
 0x10a   :  { %v155_v24 = vpop.f32.mrf.mxu0 }
 0x10b   :  { %v159_v25 = vpack.c.bf16 %v158_v23, %v158_v23 }
 0x10c   :  { %v591_v26 = vpop.f32.mrf.mxu0 }
 0x10d   :  { %609 = vmatmul.mubr.bf16.vlgmr.msra.gmra.mxu1 %v159_v25 }
 0x10e   :  { %648 = vmatprep.mubr.msk.bf16.mxu1 %vm828_vm0, %v827_v0  ;;  %633 = vmatpush3.bf16.msra.mxu1 %v680_v29 }
 0x10f   :  { %634 = vmatprep.subr.bf16.mxu1 %v827_v0 }
 0x112   :  { %635 = vmatpush3.bf16.msra.mxu1 %v681_v30 }
 0x113   :  { %636 = vmatprep.subr.bf16.mxu1 %v827_v0 }
 0x116   :  { %637 = vmatpush3.bf16.msra.mxu1 %v682_v31 }
 0x117   :  { %638 = vmatprep.subr.bf16.mxu1 %v827_v0 }
 0x11a   :  { %639 = vmatpush3.bf16.msra.mxu1 %v683_v32 }
 0x11b   :  { %640 = vmatprep.subr.bf16.mxu1 %v827_v0 }
 0x11e   :  { %641 = vmatpush3.bf16.msra.mxu1 %v684_v33 }
 0x11f   :  { %642 = vmatprep.subr.bf16.mxu1 %v827_v0 }
 0x122   :  { %643 = vmatpush3.bf16.msra.mxu1 %v685_v34 }
 0x123   :  { %644 = vmatprep.subr.bf16.mxu1 %v827_v0 }
 0x126   :  { %645 = vmatpush3.bf16.msra.mxu1 %v686_v43 }
 0x127   :  { %646 = vmatprep.subr.bf16.mxu1 %v827_v0 }
 0x12a   :  { %647 = vmatpush3.bf16.msra.mxu1 %v687_v44 }
 0x1cd   :  { %v263_v36 = vpop.f32.mrf.mxu1 }
 0x1ce   :  { %v264_v37 = vadd.f32 %v527_v35, %v263_v36 }
 0x1cf   :  { %v610_v38 = vpop.f32.mrf.mxu1 }
 0x1d0   :  { %v269_v39 = vmax.f32 %v264_v37, 0.0 }
 0x1d1   :  { %v266_v40 = vpop.f32.mrf.mxu1 }
 0x1d2   :  { %v270_v41 = vpack.c.bf16 %v269_v39, %v269_v39 }
 0x1d3   :  { %v611_v42 = vpop.f32.mrf.mxu1 }
 0x1d4   :  { %629 = vmatmul.mubr.bf16.vlgmr.msra.gmra.mxu0 %v270_v41 }
 0x294   :  { %v374_v46 = vpop.f32.mrf.mxu0 }
 0x295   :  { %v375_v47 = vadd.f32 %v536_v45, %v374_v46 }
 0x296   :  { %v630_v48 = vpop.f32.mrf.mxu0 }
 0x297   :  { %v380_v49 = vmax.f32 %v375_v47, 0.0 }
 0x298   :  { %v377_v50 = vpop.f32.mrf.mxu0 }
 0x299   :  { %v381_v51 = vpack.c.bf16 %v380_v49, %v380_v49 }
 0x29a   :  { %v631_v52 = vpop.f32.mrf.mxu0 }
 0x29b   :  { %649 = vmatmul.mubr.bf16.vlgmr.msra.gmra.mxu1 %v381_v51 }
 0x35b   :  { %v485_v56 = vpop.f32.mrf.mxu1 }
 0x35c   :  { %v486_v57 = vadd.f32 %v545_v55, %v485_v56 }
 0x35d   :  { %v650_v58 = vpop.f32.mrf.mxu1 }
 0x35e   :  { %v494_v59 = vsel %vm493_vm2, %v486_v57, -3.4028235e+38 }
 0x35f   :  { %495 = vmax.xlane.f32.xlu0 %v494_v59  ;;  %v488_v60 = vpop.f32.mrf.mxu1 }
 0x361   :  { %v651_v61 = vpop.f32.mrf.mxu1 }
 0x3e8   :  { %v496_v62 = vpop.xlane.xlu0 %495 }
 0x3e9   :  { %v497_v63 = vsub.f32 %v494_v59, %v496_v62 }
 0x3eb   :  { %v498_v0 = vmul.f32 1.442695, %v497_v63 }
 0x3ed   :  { %688 = vpow2.f32 %v498_v0 }
 0x3fa   :  { %v689_v1 = vpop.eup %688 }
 0x3fb   :  { %500 = vadd.xlane.f32.xlu0 %v689_v1 }
 0x484   :  { %v501_v2 = vpop.xlane.xlu0 %500 }
 0x485   :  { %690 = vrcp.f32 %v501_v2 }
 0x492   :  { %v691_v3 = vpop.eup %690 }
 0x493   :  { %v503_v4 = vmul.f32 %v691_v3, %v689_v1 }
 0x495   :  { %v504_v5 = vpack.c.bf16 %v503_v4, %v503_v4 }
 0x497   :  { %505 = vst [vmem:[#allocation11] sm:$0xf] %v504_v5 }
 0x498   :  { %803 = shalt.err (!%p800_p1)
}
 0x499   :  { %515 = dma.vmem_to_hbm [thread:$0]  %s513_s28, 64, %s947_s6, [#allocation4]  }
 0x49a   :  { %818 = dma.done.wait [#allocation4], 64  }
 0x49b   :  { %819 = vsyncadd [#allocation4], 4294967232 }
 0x49c   :  { %519 = vsyncpa [#allocation3], 1 }
 0x49d   :  { %520 = vsyncpa [#allocation6], 1 }
 0x49e   :  { %521 = vsyncpa [#allocation9], 1 }
 0x49f   :  { %522 = vsyncpa [#allocation4], 1 }

</bundles_post_ra>
